<compile_context>
chip_gen: v7x
topology: tpu7x:2x2x1
jax: 0.10.0
libtpu: 0.0.40
codegen_flags: <defaults>
</compile_context>

<pallas_src>
import functools

import jax
import jax.numpy as jnp
import numpy as np
from jax.experimental import pallas as pl
from jax.experimental.pallas import tpu as pltpu


# --------------------------------------------------------------------------
# numpy reference (mirrors the PyTorch module exactly)
# --------------------------------------------------------------------------
def _reference(epoch, max_weight, max_epoch, ramp="sigmoid"):
    current = np.clip(epoch, 0.0, max_epoch)
    phase = 1.0 - current / max_epoch
    if ramp == "sigmoid":
        ramps = float(np.exp(-5.0 * phase * phase))
    elif ramp == "log":
        ramps = float(1 - np.exp(-5.0 * current / max_epoch))
    elif ramp == "exp":
        ramps = float(np.exp(5.0 * (current / max_epoch - 1)))
    else:
        ramps = 1.0
    return max_weight * ramps


# --------------------------------------------------------------------------
# Pure-jnp inline form — the DEFAULT path for traced epochs.
# Lowers to a handful of fused VPU/EUP ops inside whatever consumes the weight.
# --------------------------------------------------------------------------
def consistency_weight_inline(epoch, *, max_weight, max_epoch, ramp="sigmoid"):
    max_weight = float(max_weight)
    max_epoch = float(max_epoch)
    if ramp not in ("sigmoid", "log", "exp") or max_epoch <= 0.0:
        return jnp.float32(max_weight)
    e = jnp.asarray(epoch, dtype=jnp.float32)
    current = jnp.clip(e, 0.0, max_epoch)
    frac = current * (1.0 / max_epoch)        # static reciprocal, no divide
    if ramp == "sigmoid":
        phase = 1.0 - frac
        ramps = jnp.exp(-5.0 * phase * phase)
    elif ramp == "log":
        ramps = 1.0 - jnp.exp(-5.0 * frac)
    else:  # 'exp'
        ramps = jnp.exp(5.0 * (frac - 1.0))
    return (max_weight * ramps).astype(jnp.float32)


# --------------------------------------------------------------------------
# Public wrapper: semantics of ConsistencyWeight(max_weight, max_epoch, ramp)(epoch)
# --------------------------------------------------------------------------
def consistency_weight(epoch, *, max_weight, max_epoch, ramp="sigmoid"):
    """Returns the consistency weight as a 0-d float32 (device value if epoch is traced)."""
    max_weight = float(max_weight)
    max_epoch = float(max_epoch)

    # Fast path 1: constant / unknown ramp or degenerate schedule -> constant.
    if ramp not in ("sigmoid", "log", "exp") or max_epoch <= 0.0:
        return jnp.float32(max_weight)

    # Fast path 2: static Python/numpy scalar epoch -> fold at trace time.
    if isinstance(epoch, (int, float, np.integer, np.floating)):
        return jnp.float32(_reference(float(epoch), max_weight, max_epoch, ramp))

    # Traced epoch: inline jnp (fuses into the consuming loss; no kernel launch).
    return consistency_weight_inline(
        epoch, max_weight=max_weight, max_epoch=max_epoch, ramp=ramp)


# --------------------------------------------------------------------------
# Pallas kernel: the ramp folded INTO a consumer loss kernel (review pattern).
# Computes  consistency_weight(epoch) * mean((pred - target)^2)  in one launch.
# epoch lives in SMEM; the ramp is computed on a (1,1) vreg (EUP exp slot is
# free filler next to the VPU subtract/square and XLU reduction).
# --------------------------------------------------------------------------
def _weighted_mse_kernel(epoch_ref, pred_ref, target_ref, out_ref, *,
                         max_weight, max_epoch, inv_max_epoch, ramp, inv_n):
    diff = pred_ref[...] - target_ref[...]
    sq_mean = jnp.sum(diff * diff, keepdims=True) * inv_n       # (1, 1) f32

    # Ramp schedule on a (1,1) vreg (avoids scalar-unit float transcendentals).
    e = jnp.full((1, 1), epoch_ref[0], dtype=jnp.float32)
    current = jnp.clip(e, 0.0, max_epoch)
    frac = current * inv_max_epoch
    if ramp == "sigmoid":
        phase = 1.0 - frac
        ramps = jnp.exp(-5.0 * phase * phase)
    elif ramp == "log":
        ramps = 1.0 - jnp.exp(-5.0 * frac)
    elif ramp == "exp":
        ramps = jnp.exp(5.0 * (frac - 1.0))
    else:  # 'constant'
        ramps = jnp.ones_like(current)

    out_ref[...] = (max_weight * ramps * sq_mean).astype(out_ref.dtype)


def consistency_weighted_mse(pred, target, epoch, *, max_weight, max_epoch,
                             ramp="sigmoid"):
    """Fused Pallas kernel: consistency_weight(epoch) * mean((pred-target)**2)."""
    max_weight = float(max_weight)
    max_epoch = float(max_epoch)
    if ramp not in ("sigmoid", "log", "exp") or max_epoch <= 0.0:
        ramp_eff, inv_max_epoch = "constant", 0.0
    else:
        ramp_eff, inv_max_epoch = ramp, 1.0 / max_epoch

    pred = jnp.asarray(pred, dtype=jnp.float32)
    target = jnp.asarray(target, dtype=jnp.float32)
    epoch_arr = jnp.asarray(epoch, dtype=jnp.float32).reshape(1)
    n = pred.size

    kernel = functools.partial(
        _weighted_mse_kernel,
        max_weight=max_weight,
        max_epoch=max_epoch,
        inv_max_epoch=inv_max_epoch,
        ramp=ramp_eff,
        inv_n=1.0 / float(n),
    )
    out = pl.pallas_call(
        kernel,
        out_shape=jax.ShapeDtypeStruct((1, 1), jnp.float32),
        in_specs=[
            pl.BlockSpec(memory_space=pltpu.SMEM),   # epoch scalar
            pl.BlockSpec(memory_space=pltpu.VMEM),   # pred (full block)
            pl.BlockSpec(memory_space=pltpu.VMEM),   # target (full block)
        ],
        out_specs=pl.BlockSpec(memory_space=pltpu.VMEM),
        cost_estimate=pl.CostEstimate(
            flops=3 * n + 12, transcendentals=1, bytes_accessed=8 * n + 12),
    )(epoch_arr, pred, target)
    return out.reshape(())


if __name__ == "__main__":
    key = jax.random.PRNGKey(0)
    max_weight = 10.0
    max_epoch = 40.0

    k1, k2, k3 = jax.random.split(key, 3)
    # Epochs including values past max_epoch to exercise the clip.
    epochs = jax.random.uniform(k1, (4,), minval=0.0, maxval=1.5 * max_epoch)
    epochs_np = np.asarray(jax.block_until_ready(epochs))

    # Consumer-loss inputs for the fused Pallas kernel.
    pred = jax.random.normal(k2, (16, 128), dtype=jnp.float32)
    target = jax.random.normal(k3, (16, 128), dtype=jnp.float32)
    pred_np = np.asarray(jax.block_until_ready(pred))
    target_np = np.asarray(jax.block_until_ready(target))
    mse_ref = float(np.mean((pred_np - target_np) ** 2))

    ok = True
    for ramp in ("sigmoid", "log", "exp", "constant"):
        for i in range(epochs_np.shape[0]):
            want_w = _reference(float(epochs_np[i]), max_weight, max_epoch, ramp)

            # Default path (traced epoch -> inline jnp, fused by XLA).
            got_w = jax.block_until_ready(consistency_weight(
                epochs[i], max_weight=max_weight, max_epoch=max_epoch, ramp=ramp))
            if not np.allclose(np.asarray(got_w), want_w, rtol=1e-4, atol=1e-5):
                ok = False
                print(f"MISMATCH (inline) ramp={ramp} epoch={epochs_np[i]}: "
                      f"got {np.asarray(got_w)}, want {want_w}")

            # Static Python-scalar path (trace-time fold, no device work).
            got_ws = jax.block_until_ready(consistency_weight(
                float(epochs_np[i]), max_weight=max_weight,
                max_epoch=max_epoch, ramp=ramp))
            if not np.allclose(np.asarray(got_ws), want_w, rtol=1e-4, atol=1e-5):
                ok = False
                print(f"MISMATCH (static fold) ramp={ramp} epoch={epochs_np[i]}: "
                      f"got {np.asarray(got_ws)}, want {want_w}")

            # Fused Pallas consumer kernel: weight folded into the loss.
            got_loss = jax.block_until_ready(consistency_weighted_mse(
                pred, target, epochs[i], max_weight=max_weight,
                max_epoch=max_epoch, ramp=ramp))
            want_loss = want_w * mse_ref
            if not np.allclose(np.asarray(got_loss), want_loss,
                               rtol=1e-4, atol=1e-5):
                ok = False
                print(f"MISMATCH (pallas fused) ramp={ramp} epoch={epochs_np[i]}: "
                      f"got {np.asarray(got_loss)}, want {want_loss}")

    if ok:
        print("KERNEL_OK")
</pallas_src>

<mosaic_0001>
module attributes {stable_mosaic.version = 11 : i64} {
  func.func @_weighted_mse_kernel(%arg0: memref<1xf32, #tpu.memory_space<smem>>, %arg1: memref<16x128xf32, #tpu.memory_space<vmem>>, %arg2: memref<16x128xf32, #tpu.memory_space<vmem>>, %arg3: memref<1x1xf32, #tpu.memory_space<vmem>>) attributes {dimension_semantics = [], scalar_prefetch = 0 : i64, scratch_operands = 0 : i64, tpu.core_type = #tpu.core_type<tc>} {
    %c0 = arith.constant 0 : index
    %c0_0 = arith.constant 0 : index
    %0 = vector.load %arg1[%c0, %c0_0] : memref<16x128xf32, #tpu.memory_space<vmem>>, vector<16x128xf32>
    %c0_1 = arith.constant 0 : index
    %c0_2 = arith.constant 0 : index
    %1 = vector.load %arg2[%c0_1, %c0_2] : memref<16x128xf32, #tpu.memory_space<vmem>>, vector<16x128xf32>
    %2 = arith.subf %0, %1 : vector<16x128xf32>
    %3 = arith.mulf %2, %2 : vector<16x128xf32>
    %4 = vector.shape_cast %3 : vector<16x128xf32> to vector<1x16x128xf32>
    %cst = arith.constant dense<0.000000e+00> : vector<1xf32>
    %5 = vector.multi_reduction <add>, %4, %cst [1, 2] : vector<1x16x128xf32> to vector<1xf32>
    %6 = vector.shape_cast %5 : vector<1xf32> to vector<1x1x1xf32>
    %7 = vector.extract %6[0, 0, 0] : f32 from vector<1x1x1xf32>
    %8 = vector.broadcast %7 : f32 to vector<1x1xf32>
    %cst_3 = arith.constant 4.8828125E-4 : f32
    %9 = vector.broadcast %cst_3 : f32 to vector<1x1xf32>
    %10 = arith.mulf %8, %9 : vector<1x1xf32>
    %c0_4 = arith.constant 0 : index
    %11 = memref.load %arg0[%c0_4] : memref<1xf32, #tpu.memory_space<smem>>
    %12 = vector.broadcast %11 : f32 to vector<1x1xf32>
    %cst_5 = arith.constant 0.000000e+00 : f32
    %cst_6 = arith.constant 4.000000e+01 : f32
    %13 = vector.broadcast %cst_5 : f32 to vector<1x1xf32>
    %14 = arith.maximumf %13, %12 : vector<1x1xf32>
    %15 = vector.broadcast %cst_6 : f32 to vector<1x1xf32>
    %16 = arith.minimumf %15, %14 : vector<1x1xf32>
    %cst_7 = arith.constant 2.500000e-02 : f32
    %17 = vector.broadcast %cst_7 : f32 to vector<1x1xf32>
    %18 = arith.mulf %16, %17 : vector<1x1xf32>
    %cst_8 = arith.constant 1.000000e+00 : f32
    %19 = vector.broadcast %cst_8 : f32 to vector<1x1xf32>
    %20 = arith.subf %19, %18 : vector<1x1xf32>
    %cst_9 = arith.constant -5.000000e+00 : f32
    %21 = vector.broadcast %cst_9 : f32 to vector<1x1xf32>
    %22 = arith.mulf %21, %20 : vector<1x1xf32>
    %23 = arith.mulf %22, %20 : vector<1x1xf32>
    %24 = math.exp %23 : vector<1x1xf32>
    %cst_10 = arith.constant 1.000000e+01 : f32
    %25 = vector.broadcast %cst_10 : f32 to vector<1x1xf32>
    %26 = arith.mulf %25, %24 : vector<1x1xf32>
    %27 = arith.mulf %26, %10 : vector<1x1xf32>
    %c0_11 = arith.constant 0 : index
    %c0_12 = arith.constant 0 : index
    %28 = vector.load %arg3[%c0_11, %c0_12] : memref<1x1xf32, #tpu.memory_space<vmem>>, vector<1x1xf32>
    tpu.vector_store %arg3[%c0_11, %c0_12], %27 {strides = array<i32>} : memref<1x1xf32, #tpu.memory_space<vmem>>, vector<1x1xf32>,
    return
  }
}

</mosaic_0001>

<bundles_post_ra>
// kernel: tpu_custom_call.1
= control target key start
LH: loop header
LB: loop body
LE: loop exit
PB: predicated region body
PF: predicated region fallthrough
CT: control target
= control target key end

     0   :  { %9 = vsyncpa [#allocation4], 0  ;;  %s239_s0 = inlined_call_operand.<no memory space> [shape: f32[1], index: 0, kind: input, shape index: {}]   ;;  %s240_s1 = inlined_call_operand.hbm [shape: f32[16,128], index: 1, kind: input, shape index: {}]   ;;  %s241_s2 = inlined_call_operand.hbm [shape: f32[16,128], index: 2, kind: input, shape index: {}]   ;;  %s242_s3 = inlined_call_operand.hbm [shape: f32[1,1], index: 3, kind: output, shape index: {}]  }
   0x1   :  { %10 = vsyncpa [#allocation7], 0 }
   0x2   :  { %11 = vsyncpa [#allocation5], 0  ;;  %s175_s12 = smov [#allocation3]   ;;  %s103_s16 = scalar_lea.hbm %s240_s1, 256 }
   0x3   :  { %s19_s13 = sshll.u32 %s175_s12, 4  ;;  %p104_p0 = scmp.ne.s32.totalorder %s240_s1, %s103_s16  ;;  %s20_s13 = int_to_ptr.vmem [resolvable:$true] %s19_s13 }
   0x4   :  { %p107_p1 = scmp.lt.u32.totalorder %s103_s16, %s240_s1 }
   0x6   :  { %p109_p2 = pnand %p107_p1, %p104_p0 }
   0x8   :  { %112 = shalt.err (!%p109_p2)
}
   0x9   :  { %s113_s21 = scalar_lea.vmem %s20_s13, 256  ;;  %p118_p4 = scmp.lt.s32.totalorder %s20_s13, %s20_s13 }
   0xa   :  { %p114_p3 = scmp.ne.s32.totalorder %s20_s13, %s113_s21  ;;  %p119_p5 = scmp.lt.s32.totalorder %s113_s21, %s113_s21 }
   0xc   :  { %p120_p6 = por %p119_p5, %p118_p4 }
   0xe   :  { %p121_p7 = pnand %p120_p6, %p114_p3 }
  0x10   :  { %124 = shalt.err (!%p121_p7)
}
  0x11   :  { %s176_s22 = smov 128   ;;  %s177_s23 = smov 8  }
  0x12   :  { %25 = dma.hbm_to_vmem [thread:$0]  %s240_s1, 256, %s20_s13, [#allocation4], %s176_s22, %s176_s22, %s177_s23  }
  0x13   :  { %s178_s26 = smov [#allocation6]   ;;  %s125_s30 = scalar_lea.hbm %s241_s2, 256 }
  0x14   :  { %s31_s27 = sshll.u32 %s178_s26, 4  ;;  %p126_p8 = scmp.ne.s32.totalorder %s241_s2, %s125_s30  ;;  %s32_s27 = int_to_ptr.vmem [resolvable:$true] %s31_s27 }
  0x15   :  { %p129_p9 = scmp.lt.u32.totalorder %s125_s30, %s241_s2 }
  0x17   :  { %p131_p10 = pnand %p129_p9, %p126_p8 }
  0x19   :  { %134 = shalt.err (!%p131_p10)
}
  0x1a   :  { %s135_s8 = scalar_lea.vmem %s32_s27, 256  ;;  %p140_p12 = scmp.lt.s32.totalorder %s32_s27, %s32_s27 }
  0x1b   :  { %p136_p11 = scmp.ne.s32.totalorder %s32_s27, %s135_s8  ;;  %p141_p13 = scmp.lt.s32.totalorder %s135_s8, %s135_s8 }
  0x1d   :  { %p142_p0 = por %p141_p13, %p140_p12 }
  0x1f   :  { %p143_p1 = pnand %p142_p0, %p136_p11 }
  0x21   :  { %146 = shalt.err (!%p143_p1)
}
  0x22   :  { %37 = dma.hbm_to_vmem [thread:$0]  %s241_s2, 256, %s32_s27, [#allocation7], %s176_s22, %s176_s22, %s177_s23  }
  0x23   :  { %169 = dma.done.wait [#allocation4], 256  }
  0x24   :  { %170 = vsyncadd [#allocation4], 4294967040 }
  0x25   :  { %171 = dma.done.wait [#allocation7], 256  }
  0x26   :  { %172 = vsyncadd [#allocation7], 4294967040  ;;  %v44_v0 = vld [vmem:[#allocation3] sm:$0xff]  ;;  %v45_v1 = vld [vmem:[#allocation3 + $0x8] sm:$0xff]  ;;  %v65_v16 = vstv %s239_s0  ;;  %s179_s12 = smov [#allocation8]   ;;  %vm76_vm0 = vcmask 0  }
  0x27   :  { %v46_v2 = vld [vmem:[#allocation6] sm:$0xff]  ;;  %v47_v3 = vld [vmem:[#allocation6 + $0x8] sm:$0xff]  ;;  %v66_v17 = vmax.f32 %v65_v16, 0.0  ;;  %s84_s13 = sshll.u32 %s179_s12, 4  ;;  %s85_s13 = int_to_ptr.vmem [resolvable:$true] %s84_s13 }
  0x28   :  { %v48_v4 = vsub.f32 %v44_v0, %v46_v2  ;;  %v49_v5 = vsub.f32 %v45_v1, %v47_v3  ;;  %s147_s0 = scalar_lea.vmem %s85_s13, 16  ;;  %s151_s14 = scalar_lea.vmem %s85_s13, 32 }
  0x29   :  { %v67_v18 = vmin.f32 %v66_v17, 40.0  ;;  %p148_p2 = scmp.ne.s32.totalorder %s85_s13, %s147_s0  ;;  %p152_p3 = scmp.lt.s32.totalorder %s85_s13, %s85_s13 }
  0x2a   :  { %v50_v6 = vmul.f32 %v48_v4, %v48_v4  ;;  %v51_v7 = vmul.f32 %v49_v5, %v49_v5  ;;  %p153_p4 = scmp.lt.s32.totalorder %s151_s14, %s147_s0 }
  0x2b   :  { %v68_v19 = vmul.f32 0.025, %v67_v18 }
  0x2c   :  { %v52_v8 = vadd.f32 %v51_v7, %v50_v6  ;;  %p154_p5 = por %p153_p4, %p152_p3 }
  0x2d   :  { %v69_v20 = vsub.f32 1.0, %v68_v19 }
  0x2e   :  { %53 = vadd.xlane.f32.xlu0 %v52_v8  ;;  %p155_p6 = pnand %p154_p5, %p148_p2 }
  0x2f   :  { %v70_v21 = vmul.f32 -5.0, %v69_v20 }
  0x31   :  { %v71_v22 = vmul.f32 %v70_v21, %v69_v20 }
  0x33   :  { %v72_v23 = vmul.f32 1.442695, %v71_v22 }
  0x35   :  { %101 = vpow2.f32 %v72_v23 }
  0x3f   :  { %v102_v24 = vpop.eup %101 }
  0x40   :  { %v74_v25 = vmul.f32 10.0, %v102_v24 }
  0xbb   :  { %v54_v9 = vpop.xlane.xlu0 %53 }
  0xbc   :  { %v55_v10 = vrot.slane %v54_v9, 4 }
  0xbe   :  { %v56_v11 = vadd.f32 %v55_v10, %v54_v9 }
  0xc0   :  { %v57_v12 = vrot.slane %v56_v11, 2 }
  0xc2   :  { %v58_v13 = vadd.f32 %v57_v12, %v56_v11 }
  0xc4   :  { %v59_v14 = vrot.slane %v58_v13, 1 }
  0xc6   :  { %v60_v15 = vadd.f32 %v59_v14, %v58_v13 }
  0xc8   :  { %94 = vpush %v60_v15 }
  0xf9   :  { %s95_s11 = spop %94 }
  0xfa   :  { %v62_v26 = vstv %s95_s11 }
  0xfb   :  { %v63_v27 = vmul.f32 0.00048828125, %v62_v26 }
  0xfd   :  { %v75_v28 = vmul.f32 %v74_v25, %v63_v27 }
  0xff   :  { %77 = vst.msk [vmem:[#allocation8] sm:$0x1] %vm76_vm0, %v75_v28 }
 0x100   :  { %158 = shalt.err (!%p155_p6)
}
 0x101   :  { %s159_s17 = scalar_lea.hbm %s242_s3, 16 }
 0x102   :  { %p160_p7 = scmp.ne.s32.totalorder %s242_s3, %s159_s17  ;;  %p163_p8 = scmp.lt.u32.totalorder %s159_s17, %s242_s3 }
 0x104   :  { %p165_p9 = pnand %p163_p8, %p160_p7 }
 0x106   :  { %168 = shalt.err (!%p165_p9)
}
 0x107   :  { %87 = dma.vmem_to_hbm [thread:$0]  %s85_s13, 16, %s242_s3, [#allocation5]  }
 0x108   :  { %173 = dma.done.wait [#allocation5], 16  }
 0x109   :  { %174 = vsyncadd [#allocation5], 4294967280 }
 0x10a   :  { %91 = vsyncpa [#allocation4], 1 }
 0x10b   :  { %92 = vsyncpa [#allocation7], 1 }
 0x10c   :  { %93 = vsyncpa [#allocation5], 1 }

</bundles_post_ra>
